<compile_context>
chip_gen: v7x
topology: tpu7x:2x2x1
jax: 0.10.0
libtpu: 0.0.40
codegen_flags: <defaults>
</compile_context>

<pallas_src>
import jax
import jax.numpy as jnp
from jax.experimental import pallas as pl
from jax.experimental.pallas import tpu as pltpu


def _round_up(x, m):
    return ((x + m - 1) // m) * m


def _cdiv(a, b):
    return (a + b - 1) // b


def _choose_tm(M):
    """Row-tile size.

    Large tiles (up to 2048 rows) amortize the fixed per-grid-step overhead, but for
    medium/large M we force >= 4 grid steps so the 'parallel' M axis can be sharded
    across v7x's two TensorCores, and TM tracks cdiv(M, n_steps) so the padded tail
    is < 8 rows per step (no multi-MiB dead DMA traffic).
    """
    TM_MAX = 2048
    MIN_STEPS = 4
    if M <= 1024:
        return max(8, _round_up(M, 8))          # single tile; grid=(1,)
    n_steps = max(MIN_STEPS, _cdiv(M, TM_MAX))
    return _round_up(_cdiv(M, n_steps), 8)


def _complex_dense_kernel(xr_ref, xi_ref, wr_ref, wi_ref, br_ref, bi_ref,
                          yr_ref, yi_ref):
    # Two independent small MXU matmuls + VPU bias adds; matches the two separate
    # nn.Linear layers applied to the real / imag planes of the PyTorch module.
    yr_ref[...] = (
        jnp.dot(xr_ref[...], wr_ref[...],
                preferred_element_type=jnp.float32,
                precision=jax.lax.Precision.HIGHEST)
        + br_ref[...]
    )
    yi_ref[...] = (
        jnp.dot(xi_ref[...], wi_ref[...],
                preferred_element_type=jnp.float32,
                precision=jax.lax.Precision.HIGHEST)
        + bi_ref[...]
    )


@jax.jit
def complex_dense(x, w_real, w_imag, b_real, b_imag):
    """x: complex64 (..., in_ch). w_*: (in_ch, out_ch) (transposed torch weights).
    b_*: (out_ch,). Returns complex64 (..., out_ch)."""
    in_ch = x.shape[-1]
    out_ch = w_real.shape[-1]
    lead = x.shape[:-1]

    # ---- split activations into real / imag planes (flattened rows) ----------
    # TODO(synk): a complex64<->f32 bitcast would avoid materializing both planes,
    # but lax.bitcast_convert_type does not support complex dtypes.
    xr = jnp.real(x).astype(jnp.float32).reshape(-1, in_ch)
    xi = jnp.imag(x).astype(jnp.float32).reshape(-1, in_ch)
    M = xr.shape[0]

    if M == 0:  # empty-input guard (avoids TM=0 / divide-by-zero)
        z = jnp.zeros((*lead, out_ch), jnp.float32)
        return jax.lax.complex(z, z)

    # ---- adaptive row tiling --------------------------------------------------
    TM = _choose_tm(M)
    M_pad = _round_up(M, TM)
    if M_pad != M:
        pad = ((0, M_pad - M), (0, 0))
        xr = jnp.pad(xr, pad)
        xi = jnp.pad(xi, pad)
    grid = (M_pad // TM,)

    wr = w_real.astype(jnp.float32)
    wi = w_imag.astype(jnp.float32)
    br = b_real.astype(jnp.float32).reshape(1, out_ch)
    bi = b_imag.astype(jnp.float32).reshape(1, out_ch)

    # VMEM: double-buffered xr/xi/yr/yi tiles + tiny resident weights/biases.
    vmem_needed = 4 * (
        2 * 2 * TM * in_ch          # xr, xi tiles (double-buffered)
        + 2 * 2 * TM * out_ch       # yr, yi tiles (double-buffered)
        + 2 * 2 * in_ch * out_ch    # weights
        + 2 * 2 * out_ch            # biases
    )
    # 2x headroom, capped at 48 MiB: safe under v7x's 64 MiB physical VMEM and far
    # below the 128 MiB on v5e/v6e (actual need here is only a few MiB at TM=2048).
    vmem_limit = int(min(max(2 * vmem_needed, 8 << 20), 48 << 20))

    flops = 2 * 2 * M_pad * in_ch * out_ch
    bytes_accessed = 4 * (2 * M_pad * in_ch + 2 * M_pad * out_ch
                          + 2 * in_ch * out_ch + 2 * out_ch)

    yr_full, yi_full = pl.pallas_call(
        _complex_dense_kernel,
        out_shape=(jax.ShapeDtypeStruct((M_pad, out_ch), jnp.float32),
                   jax.ShapeDtypeStruct((M_pad, out_ch), jnp.float32)),
        grid=grid,
        in_specs=[
            pl.BlockSpec((TM, in_ch), lambda i: (i, 0)),       # xr tile
            pl.BlockSpec((TM, in_ch), lambda i: (i, 0)),       # xi tile
            pl.BlockSpec((in_ch, out_ch), lambda i: (0, 0)),   # w_real (resident)
            pl.BlockSpec((in_ch, out_ch), lambda i: (0, 0)),   # w_imag (resident)
            pl.BlockSpec((1, out_ch), lambda i: (0, 0)),       # b_real (resident)
            pl.BlockSpec((1, out_ch), lambda i: (0, 0)),       # b_imag (resident)
        ],
        out_specs=(pl.BlockSpec((TM, out_ch), lambda i: (i, 0)),
                   pl.BlockSpec((TM, out_ch), lambda i: (i, 0))),
        compiler_params=pltpu.CompilerParams(
            dimension_semantics=("parallel",),
            vmem_limit_bytes=vmem_limit,
        ),
        cost_estimate=pl.CostEstimate(flops=flops, transcendentals=0,
                                      bytes_accessed=bytes_accessed),
    )(xr, xi, wr, wi, br, bi)

    # Drop row padding and re-assemble the complex output (no lane padding to strip).
    y = jax.lax.complex(yr_full[:M], yi_full[:M])
    return y.reshape(*lead, out_ch)


if __name__ == "__main__":
    # Small deterministic setup consistent with the module:
    #   in_channel=32, out_channel=32, x: complex64 (batch=2, seq=8, in_channel)
    in_channel, out_channel = 32, 32
    batch, seq = 2, 8

    key = jax.random.PRNGKey(0)
    k_xr, k_xi, k_wr, k_wi, k_br, k_bi = jax.random.split(key, 6)

    x_real = jax.random.normal(k_xr, (batch, seq, in_channel), dtype=jnp.float32)
    x_imag = jax.random.normal(k_xi, (batch, seq, in_channel), dtype=jnp.float32)
    x = jax.lax.complex(x_real, x_imag)

    # Deterministic parameter init mirroring nn.Linear's uniform(-1/sqrt(in), 1/sqrt(in)).
    # Weights stored transposed: (in_channel, out_channel).
    bound = 1.0 / jnp.sqrt(jnp.float32(in_channel))
    w_real = jax.random.uniform(k_wr, (in_channel, out_channel),
                                minval=-bound, maxval=bound, dtype=jnp.float32)
    w_imag = jax.random.uniform(k_wi, (in_channel, out_channel),
                                minval=-bound, maxval=bound, dtype=jnp.float32)
    b_real = jax.random.uniform(k_br, (out_channel,),
                                minval=-bound, maxval=bound, dtype=jnp.float32)
    b_imag = jax.random.uniform(k_bi, (out_channel,),
                                minval=-bound, maxval=bound, dtype=jnp.float32)

    y = complex_dense(x, w_real, w_imag, b_real, b_imag)
    jax.block_until_ready(y)

    # Pure-JAX reference (matches the PyTorch forward semantics); HIGHEST precision
    # so the f32-parity comparison against the kernel is apples-to-apples.
    y_ref_r = jnp.dot(x_real.reshape(-1, in_channel), w_real,
                      precision=jax.lax.Precision.HIGHEST) + b_real
    y_ref_i = jnp.dot(x_imag.reshape(-1, in_channel), w_imag,
                      precision=jax.lax.Precision.HIGHEST) + b_imag
    y_ref = jax.lax.complex(y_ref_r, y_ref_i).reshape(batch, seq, out_channel)

    assert y.shape == (batch, seq, out_channel)
    assert y.dtype == jnp.complex64
    assert jnp.allclose(y, y_ref, atol=1e-5, rtol=1e-5)

    print("KERNEL_OK")
</pallas_src>

<mosaic_0001>
module attributes {stable_mosaic.version = 11 : i64} {
  func.func @_complex_dense_kernel(%arg0: i32, %arg1: memref<16x32xf32, #tpu.memory_space<vmem>>, %arg2: memref<16x32xf32, #tpu.memory_space<vmem>>, %arg3: memref<32x32xf32, #tpu.memory_space<vmem>>, %arg4: memref<32x32xf32, #tpu.memory_space<vmem>>, %arg5: memref<1x32xf32, #tpu.memory_space<vmem>>, %arg6: memref<1x32xf32, #tpu.memory_space<vmem>>, %arg7: memref<16x32xf32, #tpu.memory_space<vmem>>, %arg8: memref<16x32xf32, #tpu.memory_space<vmem>>) attributes {dimension_semantics = [#tpu.dimension_semantics<parallel>], iteration_bounds = array<i64: 1>, scalar_prefetch = 0 : i64, scratch_operands = 0 : i64, tpu.core_type = #tpu.core_type<tc>, window_params = [{transform_indices = @transform_0, window_bounds = array<i64: 16, 32>}, {transform_indices = @transform_1, window_bounds = array<i64: 16, 32>}, {pipeline_mode = #tpu.pipeline_mode<synchronous>, transform_indices = @transform_2, window_bounds = array<i64: 32, 32>}, {pipeline_mode = #tpu.pipeline_mode<synchronous>, transform_indices = @transform_3, window_bounds = array<i64: 32, 32>}, {pipeline_mode = #tpu.pipeline_mode<synchronous>, transform_indices = @transform_4, window_bounds = array<i64: 1, 32>}, {pipeline_mode = #tpu.pipeline_mode<synchronous>, transform_indices = @transform_5, window_bounds = array<i64: 1, 32>}, {transform_indices = @transform_6, window_bounds = array<i64: 16, 32>}, {transform_indices = @transform_7, window_bounds = array<i64: 16, 32>}]} {
    %c0 = arith.constant 0 : index
    %c0_0 = arith.constant 0 : index
    %0 = vector.load %arg1[%c0, %c0_0] : memref<16x32xf32, #tpu.memory_space<vmem>>, vector<16x32xf32>
    %c0_1 = arith.constant 0 : index
    %c0_2 = arith.constant 0 : index
    %1 = vector.load %arg3[%c0_1, %c0_2] : memref<32x32xf32, #tpu.memory_space<vmem>>, vector<32x32xf32>
    %cst = arith.constant dense<0.000000e+00> : vector<16x32xf32>
    %2 = tpu.matmul %0, %1, %cst {dimension_numbers = #tpu.dot_dimension_numbers<[1], [0], [0], [1], [0, 0, 1, 1], [], []>, precision = #tpu.contract_precision<fp32>} : vector<16x32xf32>, vector<32x32xf32>, vector<16x32xf32> -> vector<16x32xf32>
    %c0_3 = arith.constant 0 : index
    %c0_4 = arith.constant 0 : index
    %3 = vector.load %arg5[%c0_3, %c0_4] : memref<1x32xf32, #tpu.memory_space<vmem>>, vector<1x32xf32>
    %4 = vector.broadcast %3 : vector<1x32xf32> to vector<16x32xf32>
    %5 = arith.addf %2, %4 : vector<16x32xf32>
    %c0_5 = arith.constant 0 : index
    %c0_6 = arith.constant 0 : index
    %6 = vector.load %arg7[%c0_5, %c0_6] : memref<16x32xf32, #tpu.memory_space<vmem>>, vector<16x32xf32>
    tpu.vector_store %arg7[%c0_5, %c0_6], %5 {strides = array<i32>} : memref<16x32xf32, #tpu.memory_space<vmem>>, vector<16x32xf32>,
    %c0_7 = arith.constant 0 : index
    %c0_8 = arith.constant 0 : index
    %7 = vector.load %arg2[%c0_7, %c0_8] : memref<16x32xf32, #tpu.memory_space<vmem>>, vector<16x32xf32>
    %c0_9 = arith.constant 0 : index
    %c0_10 = arith.constant 0 : index
    %8 = vector.load %arg4[%c0_9, %c0_10] : memref<32x32xf32, #tpu.memory_space<vmem>>, vector<32x32xf32>
    %cst_11 = arith.constant dense<0.000000e+00> : vector<16x32xf32>
    %9 = tpu.matmul %7, %8, %cst_11 {dimension_numbers = #tpu.dot_dimension_numbers<[1], [0], [0], [1], [0, 0, 1, 1], [], []>, precision = #tpu.contract_precision<fp32>} : vector<16x32xf32>, vector<32x32xf32>, vector<16x32xf32> -> vector<16x32xf32>
    %c0_12 = arith.constant 0 : index
    %c0_13 = arith.constant 0 : index
    %10 = vector.load %arg6[%c0_12, %c0_13] : memref<1x32xf32, #tpu.memory_space<vmem>>, vector<1x32xf32>
    %11 = vector.broadcast %10 : vector<1x32xf32> to vector<16x32xf32>
    %12 = arith.addf %9, %11 : vector<16x32xf32>
    %c0_14 = arith.constant 0 : index
    %c0_15 = arith.constant 0 : index
    %13 = vector.load %arg8[%c0_14, %c0_15] : memref<16x32xf32, #tpu.memory_space<vmem>>, vector<16x32xf32>
    tpu.vector_store %arg8[%c0_14, %c0_15], %12 {strides = array<i32>} : memref<16x32xf32, #tpu.memory_space<vmem>>, vector<16x32xf32>,
    return
  }
  func.func @transform_0(%arg0: i32) -> (i32, i32) {
    %c0_i32 = arith.constant 0 : i32
    %c0_i32_0 = arith.constant 0 : i32
    return %arg0, %c0_i32 : i32, i32
  }
  func.func @transform_1(%arg0: i32) -> (i32, i32) {
    %c0_i32 = arith.constant 0 : i32
    %c0_i32_0 = arith.constant 0 : i32
    return %arg0, %c0_i32 : i32, i32
  }
  func.func @transform_2(%arg0: i32) -> (i32, i32) {
    %c0_i32 = arith.constant 0 : i32
    %c0_i32_0 = arith.constant 0 : i32
    %c0_i32_1 = arith.constant 0 : i32
    return %c0_i32, %c0_i32_0 : i32, i32
  }
  func.func @transform_3(%arg0: i32) -> (i32, i32) {
    %c0_i32 = arith.constant 0 : i32
    %c0_i32_0 = arith.constant 0 : i32
    %c0_i32_1 = arith.constant 0 : i32
    return %c0_i32, %c0_i32_0 : i32, i32
  }
  func.func @transform_4(%arg0: i32) -> (i32, i32) {
    %c0_i32 = arith.constant 0 : i32
    %c0_i32_0 = arith.constant 0 : i32
    %c0_i32_1 = arith.constant 0 : i32
    return %c0_i32, %c0_i32_0 : i32, i32
  }
  func.func @transform_5(%arg0: i32) -> (i32, i32) {
    %c0_i32 = arith.constant 0 : i32
    %c0_i32_0 = arith.constant 0 : i32
    %c0_i32_1 = arith.constant 0 : i32
    return %c0_i32, %c0_i32_0 : i32, i32
  }
  func.func @transform_6(%arg0: i32) -> (i32, i32) {
    %c0_i32 = arith.constant 0 : i32
    %c0_i32_0 = arith.constant 0 : i32
    return %arg0, %c0_i32 : i32, i32
  }
  func.func @transform_7(%arg0: i32) -> (i32, i32) {
    %c0_i32 = arith.constant 0 : i32
    %c0_i32_0 = arith.constant 0 : i32
    return %arg0, %c0_i32 : i32, i32
  }
}

</mosaic_0001>

<bundles_post_ra>
// kernel: custom-call.2
= control target key start
LH: loop header
LB: loop body
LE: loop exit
PB: predicated region body
PF: predicated region fallthrough
CT: control target
= control target key end

     0   :  { %s126_s0 = inlined_call_operand.vmem [shape: f32[2,8,32], index: 0, kind: input, shape index: {}]   ;;  %s127_s1 = inlined_call_operand.vmem [shape: f32[2,8,32], index: 1, kind: input, shape index: {}]   ;;  %s128_s2 = inlined_call_operand.hbm [shape: c64[2,8,32], index: 2, kind: output, shape index: {}]  }
   0x1   :  { %s87_s11 = scalar_lea.hbm %s128_s2, 256 }
   0x2   :  { %4 = vsyncpa [#allocation0], 0  ;;  %s5_s14 = sshll.u32 %s126_s0, 4  ;;  %s6_s14 = int_to_ptr.vmem [resolvable:$true] %s5_s14 }
   0x3   :  { %s18_s15 = scalar_lea.vmem %s6_s14, 256  ;;  %p23_p1 = scmp.lt.s32.totalorder %s6_s14, %s6_s14 }
   0x4   :  { %p19_p0 = scmp.ne.s32.totalorder %s6_s14, %s18_s15  ;;  %p24_p2 = scmp.lt.s32.totalorder %s18_s15, %s18_s15 }
   0x6   :  { %p25_p3 = por %p24_p2, %p23_p1 }
   0x8   :  { %p26_p4 = pnand %p25_p3, %p19_p0 }
   0xa   :  { %29 = shalt.err (!%p26_p4)  }
   0xb   :  { %p31_p5 = scmp.ne.s32.totalorder %s128_s2, %s87_s11  ;;  %s32_s0 = scalar_lea.hbm %s128_s2, 512 }
   0xc   :  { %p33_p6 = scmp.lt.u32.totalorder %s32_s0, %s87_s11  ;;  %p34_p7 = scmp.lt.u32.totalorder %s87_s11, %s128_s2 }
   0xe   :  { %p35_p8 = por %p34_p7, %p33_p6 }
  0x10   :  { %p36_p9 = pnand %p35_p8, %p31_p5 }
  0x12   :  { %39 = shalt.err (!%p36_p9)  }
  0x13   :  { %8 = dma.vmem_to_hbm [thread:$0]  %s6_s14, 256, %s128_s2, [#allocation0] }
  0x14   :  { %65 = dma.done.wait [#allocation0], 256  }
  0x15   :  { %66 = vsyncadd [#allocation0], 4294967040 }
  0x16   :  { %10 = vsyncpa [#allocation0], 1 }
  0x17   :  { %11 = vsyncpa [#allocation1], 0  ;;  %s12_s28 = sshll.u32 %s127_s1, 4  ;;  %s13_s28 = int_to_ptr.vmem [resolvable:$true] %s12_s28 }
  0x18   :  { %s40_s29 = scalar_lea.vmem %s13_s28, 256  ;;  %p45_p11 = scmp.lt.s32.totalorder %s13_s28, %s13_s28 }
  0x19   :  { %p41_p10 = scmp.ne.s32.totalorder %s13_s28, %s40_s29  ;;  %p46_p12 = scmp.lt.s32.totalorder %s40_s29, %s40_s29 }
  0x1b   :  { %p47_p13 = por %p46_p12, %p45_p11 }
  0x1d   :  { %p48_p0 = pnand %p47_p13, %p41_p10 }
  0x1f   :  { %51 = shalt.err (!%p48_p0)  }
  0x20   :  { %p53_p1 = scmp.ne.s32.totalorder %s87_s11, %s32_s0  ;;  %p56_p2 = scmp.lt.u32.totalorder %s32_s0, %s32_s0 }
  0x22   :  { %p57_p3 = por %p56_p2, %p34_p7 }
  0x24   :  { %p59_p4 = por %p57_p3, %p33_p6 }
  0x26   :  { %p60_p5 = pnand %p59_p4, %p53_p1 }
  0x28   :  { %63 = shalt.err (!%p60_p5)  }
  0x29   :  { %15 = dma.vmem_to_hbm [thread:$0]  %s13_s28, 256, %s87_s11, [#allocation1] }
  0x2a   :  { %67 = dma.done.wait [#allocation1], 256  }
  0x2b   :  { %68 = vsyncadd [#allocation1], 4294967040 }
  0x2c   :  { %17 = vsyncpa [#allocation1], 1 }

// kernel: custom-call.1
= control target key start
LH: loop header
LB: loop body
LE: loop exit
PB: predicated region body
PF: predicated region fallthrough
CT: control target
= control target key end

     0   :  { %s59_s0 = inlined_call_operand.hbm [shape: c64[2,8,32], index: 0, kind: input, shape index: {}]   ;;  %s60_s1 = inlined_call_operand.vmem [shape: f32[2,8,32], index: 1, kind: output, shape index: {}]  }
   0x1   :  { %s2_s8 = scalar_lea.hbm %s59_s0, 256 }
   0x2   :  { %3 = vsyncpa [#allocation0], 0  ;;  %s4_s11 = sshll.u32 %s60_s1, 4  ;;  %s34_s14 = scalar_lea.hbm %s59_s0, 512  ;;  %s5_s11 = int_to_ptr.vmem [resolvable:$true] %s4_s11 }
   0x3   :  { %p11_p0 = scmp.ne.s32.totalorder %s2_s8, %s34_s14  ;;  %p13_p1 = scmp.lt.u32.totalorder %s2_s8, %s59_s0 }
   0x4   :  { %p14_p2 = scmp.lt.u32.totalorder %s34_s14, %s34_s14  ;;  %p16_p4 = scmp.lt.u32.totalorder %s34_s14, %s2_s8 }
   0x6   :  { %p15_p3 = por %p14_p2, %p13_p1 }
   0x8   :  { %p17_p5 = por %p16_p4, %p15_p3 }
   0xa   :  { %p18_p6 = pnand %p17_p5, %p11_p0 }
   0xc   :  { %21 = shalt.err (!%p18_p6)  }
   0xd   :  { %s22_s17 = scalar_lea.vmem %s5_s11, 256  ;;  %p27_p8 = scmp.lt.s32.totalorder %s5_s11, %s5_s11 }
   0xe   :  { %p23_p7 = scmp.ne.s32.totalorder %s5_s11, %s22_s17  ;;  %p28_p9 = scmp.lt.s32.totalorder %s22_s17, %s22_s17 }
  0x10   :  { %p29_p10 = por %p28_p9, %p27_p8 }
  0x12   :  { %p30_p11 = pnand %p29_p10, %p23_p7 }
  0x14   :  { %33 = shalt.err (!%p30_p11)  }
  0x15   :  { %7 = dma.hbm_to_vmem [thread:$0]  %s2_s8, 256, %s5_s11, [#allocation0] }
  0x16   :  { %35 = dma.done.wait [#allocation0], 256  }
  0x17   :  { %36 = vsyncadd [#allocation0], 4294967040 }
  0x18   :  { %9 = vsyncpa [#allocation0], 1 }

// kernel: custom-call
= control target key start
LH: loop header
LB: loop body
LE: loop exit
PB: predicated region body
PF: predicated region fallthrough
CT: control target
= control target key end

     0   :  { %2 = vsyncpa [#allocation0], 0  ;;  %s61_s0 = inlined_call_operand.hbm [shape: c64[2,8,32], index: 0, kind: input, shape index: {}]   ;;  %s62_s1 = inlined_call_operand.vmem [shape: f32[2,8,32], index: 1, kind: output, shape index: {}]  }
   0x1   :  { %s3_s8 = sshll.u32 %s62_s1, 4  ;;  %s9_s11 = scalar_lea.hbm %s61_s0, 256  ;;  %s4_s8 = int_to_ptr.vmem [resolvable:$true] %s3_s8 }
   0x2   :  { %p10_p0 = scmp.ne.s32.totalorder %s61_s0, %s9_s11  ;;  %s11_s16 = scalar_lea.hbm %s61_s0, 512 }
   0x3   :  { %p12_p1 = scmp.lt.u32.totalorder %s11_s16, %s9_s11  ;;  %p13_p2 = scmp.lt.u32.totalorder %s9_s11, %s61_s0 }
   0x5   :  { %p14_p3 = por %p13_p2, %p12_p1 }
   0x7   :  { %p15_p4 = pnand %p14_p3, %p10_p0 }
   0x9   :  { %18 = shalt.err (!%p15_p4)  }
   0xa   :  { %s19_s1 = scalar_lea.vmem %s4_s8, 256  ;;  %p24_p6 = scmp.lt.s32.totalorder %s4_s8, %s4_s8 }
   0xb   :  { %p20_p5 = scmp.ne.s32.totalorder %s4_s8, %s19_s1  ;;  %p25_p7 = scmp.lt.s32.totalorder %s19_s1, %s19_s1 }
   0xd   :  { %p26_p8 = por %p25_p7, %p24_p6 }
   0xf   :  { %p27_p9 = pnand %p26_p8, %p20_p5 }
  0x11   :  { %30 = shalt.err (!%p27_p9)  }
  0x12   :  { %6 = dma.hbm_to_vmem [thread:$0]  %s61_s0, 256, %s4_s8, [#allocation0] }
  0x13   :  { %31 = dma.done.wait [#allocation0], 256  }
  0x14   :  { %32 = vsyncadd [#allocation0], 4294967040 }
  0x15   :  { %8 = vsyncpa [#allocation0], 1 }

// kernel: complex_dense.1
= control target key start
LH: loop header
LB: loop body
LE: loop exit
PB: predicated region body
PF: predicated region fallthrough
CT: control target
= control target key end

     0   :  { %13 = vsyncpa [#allocation3], 0  ;;  %s1800_s0 = inlined_call_operand.vmem [shape: f32[16,32], index: 0, kind: input, shape index: {}]   ;;  %s1801_s1 = inlined_call_operand.vmem [shape: f32[16,32], index: 1, kind: input, shape index: {}]   ;;  %s1802_s2 = inlined_call_operand.hbm [shape: f32[32,32], index: 2, kind: input, shape index: {}]   ;;  %s1803_s3 = inlined_call_operand.hbm [shape: f32[32,32], index: 3, kind: input, shape index: {}]   ;;  %s1804_s4 = inlined_call_operand.vmem [shape: f32[1,32], index: 4, kind: input, shape index: {}]   ;;  %s1805_s5 = inlined_call_operand.vmem [shape: f32[1,32], index: 5, kind: input, shape index: {}]   ;;  %s1806_s6 = inlined_call_operand.vmem [shape: f32[16,32], index: 6, kind: output, shape index: {0}]   ;;  %s1807_s7 = inlined_call_operand.vmem [shape: f32[16,32], index: 7, kind: output, shape index: {1}]  }
   0x1   :  { %14 = vsyncpa [#allocation5], 0  ;;  %s1540_s24 = smov [#allocation2]   ;;  %s1492_s28 = scalar_lea.hbm %s1802_s2, 512 }
   0x2   :  { %s24_s25 = sshll.u32 %s1540_s24, 4  ;;  %p1493_p0 = scmp.ne.s32.totalorder %s1802_s2, %s1492_s28  ;;  %s25_s25 = int_to_ptr.vmem [resolvable:$true] %s24_s25 }
   0x3   :  { %p1496_p1 = scmp.lt.u32.totalorder %s1492_s28, %s1802_s2 }
   0x5   :  { %p1498_p2 = pnand %p1496_p1, %p1493_p0 }
   0x7   :  { %1501 = shalt.err (!%p1498_p2)
}
   0x8   :  { %s1502_s10 = scalar_lea.vmem %s25_s25, 512  ;;  %p1507_p4 = scmp.lt.s32.totalorder %s25_s25, %s25_s25 }
   0x9   :  { %p1503_p3 = scmp.ne.s32.totalorder %s25_s25, %s1502_s10  ;;  %p1508_p5 = scmp.lt.s32.totalorder %s1502_s10, %s1502_s10 }
   0xb   :  { %p1509_p6 = por %p1508_p5, %p1507_p4 }
   0xd   :  { %p1510_p7 = pnand %p1509_p6, %p1503_p3 }
   0xf   :  { %1513 = shalt.err (!%p1510_p7)
}
  0x10   :  { %s1541_s11 = smov 128   ;;  %s1542_s12 = smov 8  }
  0x11   :  { %30 = dma.hbm_to_vmem [thread:$0]  %s1802_s2, 512, %s25_s25, [#allocation3], %s1541_s11, %s1541_s11, %s1542_s12  }
  0x12   :  { %s1543_s15 = smov [#allocation4]   ;;  %s1514_s19 = scalar_lea.hbm %s1803_s3, 512 }
  0x13   :  { %s36_s16 = sshll.u32 %s1543_s15, 4  ;;  %p1515_p8 = scmp.ne.s32.totalorder %s1803_s3, %s1514_s19  ;;  %s37_s16 = int_to_ptr.vmem [resolvable:$true] %s36_s16 }
  0x14   :  { %p1518_p9 = scmp.lt.u32.totalorder %s1514_s19, %s1803_s3 }
  0x16   :  { %p1520_p10 = pnand %p1518_p9, %p1515_p8 }
  0x18   :  { %1523 = shalt.err (!%p1520_p10)
}
  0x19   :  { %s1524_s24 = scalar_lea.vmem %s37_s16, 512  ;;  %p1529_p12 = scmp.lt.s32.totalorder %s37_s16, %s37_s16 }
  0x1a   :  { %p1525_p11 = scmp.ne.s32.totalorder %s37_s16, %s1524_s24  ;;  %p1530_p13 = scmp.lt.s32.totalorder %s1524_s24, %s1524_s24 }
  0x1c   :  { %p1531_p0 = por %p1530_p13, %p1529_p12 }
  0x1e   :  { %p1532_p1 = pnand %p1531_p0, %p1525_p11 }
  0x20   :  { %1535 = shalt.err (!%p1532_p1)
}
  0x21   :  { %42 = dma.hbm_to_vmem [thread:$0]  %s1803_s3, 512, %s37_s16, [#allocation5], %s1541_s11, %s1541_s11, %s1542_s12  }
  0x22   :  { %1536 = dma.done.wait [#allocation3], 512  }
  0x23   :  { %1537 = vsyncadd [#allocation3], 4294966784 }
  0x24   :  { %1538 = dma.done.wait [#allocation5], 512  }
  0x25   :  { %1539 = vsyncadd [#allocation5], 4294966784  ;;  %v55_v0 = vld [vmem:[#allocation2] sm:$0xff]  ;;  %v56_v1 = vld [vmem:[#allocation2 + $0x8] sm:$0xff]  ;;  %vm66_vm0 = vcmask 261120  }
  0x26   :  { %v605_v2 = vld [vmem:[#allocation4] sm:$0xff]  ;;  %v74_v3 = vand.u32 4294901760, %v55_v0  ;;  %v77_v4 = vand.u32 4294901760, %v56_v1  ;;  %v606_v5 = vld [vmem:[#allocation4 + $0x8] sm:$0xff]  ;;  %v57_v7 = vld [vmem:[#allocation2 + $0x10] sm:$0xff] }
  0x27   :  { %v623_v6 = vand.u32 4294901760, %v605_v2  ;;  %v1608_v8 = vld [vmem:[#allocation2 + $0x18] sm:$0xff]  ;;  %v626_v9 = vand.u32 4294901760, %v606_v5  ;;  %v80_v10 = vand.u32 4294901760, %v57_v7  ;;  %v1611_v12 = vld [vmem:[#allocation4 + $0x10] sm:$0xff]  ;;  %v53_v14 = vld [vmem:[%s1800_s0] sm:$0xff] }
  0x28   :  { %v83_v11 = vand.u32 4294901760, %v1608_v8  ;;  %v1613_v13 = vld [vmem:[#allocation4 + $0x18] sm:$0xff]  ;;  %v1618_v15 = vpack.c.bf16 %v77_v4, %v74_v3  ;;  %v629_v16 = vand.u32 4294901760, %v1611_v12  ;;  %v68_v18 = vsel %vm66_vm0, %v53_v14, 0  ;;  %v603_v19 = vld [vmem:[%s1801_s1] sm:$0xff]  ;;  %v54_v20 = vld [vmem:[%s1800_s0 + $0x8] sm:$0xff] }
  0x29   :  { %v632_v17 = vand.u32 4294901760, %v1613_v13  ;;  %v604_v21 = vld [vmem:[%s1801_s1 + $0x8] sm:$0xff]  ;;  %v1632_v22 = vpack.c.bf16 %v626_v9, %v623_v6  ;;  %v1638_v24 = vand.u32 4294901760, %v68_v18  ;;  %v617_v25 = vsel %vm66_vm0, %v603_v19, 0 }
  0x2a   :  { %v1636_v23 = vpack.c.bf16 %v83_v11, %v80_v10  ;;  %1369 = vmatprep.subr.bf16.mxu0 %v1618_v15  ;;  %v1644_v27 = vand.u32 4294901760, %v617_v25  ;;  %v71_v28 = vsel %vm66_vm0, %v54_v20, 0  ;;  %v1647_v29 = vsub.f32 %v55_v0, %v74_v3 }
  0x2b   :  { %v1642_v26 = vpack.c.bf16 %v632_v17, %v629_v16  ;;  %1417 = vmatprep.subr.bf16.mxu1 %v1632_v22  ;;  %1371 = vmatpush3.bf16.msra.mxu0 %v1618_v15  ;;  %v1652_v30 = vsub.f32 %v68_v18, %v1638_v24  ;;  %v1654_v31 = vand.u32 4294901760, %v71_v28  ;;  %v1656_v32 = vsub.f32 %v56_v1, %v77_v4 }
  0x2c   :  { %v620_v33 = vsel %vm66_vm0, %v604_v21, 0  ;;  %1419 = vmatpush3.bf16.msra.mxu1 %v1632_v22  ;;  %1373 = vmatprep.subr.bf16.mxu0 %v1636_v23  ;;  %v1662_v34 = vsub.f32 %v617_v25, %v1644_v27  ;;  %v165_v35 = vand.u32 4294901760, %v1647_v29  ;;  %v1667_v37 = vsub.f32 %v605_v2, %v623_v6 }
  0x2d   :  { %v1665_v36 = vand.u32 4294901760, %v620_v33  ;;  %1421 = vmatprep.subr.bf16.mxu1 %v1642_v26  ;;  %v144_v38 = vand.u32 4294901760, %v1652_v30  ;;  %v1672_v39 = vsub.f32 %v71_v28, %v1654_v31  ;;  %v172_v40 = vand.u32 4294901760, %v1656_v32 }
  0x2e   :  { %v1675_v41 = vsub.f32 %v606_v5, %v626_v9  ;;  %v693_v42 = vand.u32 4294901760, %v1662_v34  ;;  %v166_v43 = vsub.f32 %v1647_v29, %v165_v35  ;;  %v714_v45 = vand.u32 4294901760, %v1667_v37 }
  0x2f   :  { %v1682_v44 = vsub.f32 %v620_v33, %v1665_v36  ;;  %1375 = vmatpush3.bf16.msra.mxu0 %v1636_v23  ;;  %v145_v46 = vsub.f32 %v1652_v30, %v144_v38  ;;  %v154_v47 = vand.u32 4294901760, %v1672_v39  ;;  %v173_v48 = vsub.f32 %v1656_v32, %v172_v40 }
  0x30   :  { %v721_v49 = vand.u32 4294901760, %v1675_v41  ;;  %1423 = vmatpush3.bf16.msra.mxu1 %v1642_v26  ;;  %v694_v50 = vsub.f32 %v1662_v34, %v693_v42  ;;  %v167_v51 = vand.u32 4294901760, %v166_v43  ;;  %v715_v53 = vsub.f32 %v1667_v37, %v714_v45 }
  0x31   :  { %v703_v52 = vand.u32 4294901760, %v1682_v44  ;;  %v146_v54 = vand.u32 4294901760, %v145_v46  ;;  %v155_v55 = vsub.f32 %v1672_v39, %v154_v47  ;;  %v174_v56 = vand.u32 4294901760, %v173_v48 }
  0x32   :  { %v722_v57 = vsub.f32 %v1675_v41, %v721_v49  ;;  %v695_v58 = vand.u32 4294901760, %v694_v50  ;;  %v716_v60 = vand.u32 4294901760, %v715_v53  ;;  %v1711_v61 = vsub.f32 %v57_v7, %v80_v10 }
  0x33   :  { %v704_v59 = vsub.f32 %v1682_v44, %v703_v52  ;;  %1244 = vmatprep.mubr.f32.mxu0 %v146_v54  ;;  %v156_v62 = vand.u32 4294901760, %v155_v55  ;;  %v1376_v63 = vpack.c.bf16 %v174_v56, %v167_v51  ;;  %v1716_v1 = vsub.f32 %v1608_v8, %v83_v11 }
  0x34   :  { %v723_v0 = vand.u32 4294901760, %v722_v57  ;;  %1310 = vmatprep.mubr.f32.mxu1 %v695_v58  ;;  %v179_v3 = vand.u32 4294901760, %v1711_v61  ;;  %v727_v4 = vsub.f32 %v1611_v12, %v629_v16  ;;  %v734_v5 = vsub.f32 %v1613_v13, %v632_v17 }
  0x35   :  { %v705_v2 = vand.u32 4294901760, %v704_v59  ;;  %1245 = vmatmul.mubr.f32.vlgmr.msra.gmra.mrb[0].mxu0 %v156_v62  ;;  %1377 = vmatprep.subr.bf16.mxu0 %v1376_v63  ;;  %v186_v7 = vand.u32 4294901760, %v1716_v1  ;;  %v1384_v20 = vpack.c.bf16 %v1656_v32, %v1647_v29  ;;  %v1432_v25 = vpack.c.bf16 %v1675_v41, %v1667_v37 }
  0x36   :  { %v1424_v6 = vpack.c.bf16 %v723_v0, %v716_v60  ;;  %1379 = vmatpush3.bf16.msra.mxu0 %v1376_v63  ;;  %v180_v9 = vsub.f32 %v1711_v61, %v179_v3  ;;  %v728_v10 = vand.u32 4294901760, %v727_v4  ;;  %v735_v8 = vand.u32 4294901760, %v734_v5  ;;  %1255 = vmatprep.mubr.f32.mxu0 %v1638_v24 }
  0x37   :  { %1311 = vmatmul.mubr.f32.vlgmr.msra.gmra.mrb[0].mxu1 %v705_v2  ;;  %v187_v11 = vsub.f32 %v1716_v1, %v186_v7  ;;  %v1388_v28 = vpack.c.bf16 %v1716_v1, %v1711_v61  ;;  %v1436_v33 = vpack.c.bf16 %v734_v5, %v727_v4  ;;  %v1400_v43 = vpack.c.bf16 %v172_v40, %v165_v35 }
  0x38   :  { %1425 = vmatprep.subr.bf16.mxu1 %v1424_v6  ;;  %v181_v12 = vand.u32 4294901760, %v180_v9  ;;  %v729_v14 = vsub.f32 %v727_v4, %v728_v10  ;;  %v736_v13 = vsub.f32 %v734_v5, %v735_v8  ;;  %1321 = vmatprep.mubr.f32.mxu1 %v1644_v27  ;;  %v1448_v46 = vpack.c.bf16 %v721_v49, %v714_v45 }
  0x39   :  { %1427 = vmatpush3.bf16.msra.mxu1 %v1424_v6  ;;  %v188_v16 = vand.u32 4294901760, %v187_v11  ;;  %v1404_v29 = vpack.c.bf16 %v186_v7, %v179_v3  ;;  %v1452_v32 = vpack.c.bf16 %v735_v8, %v728_v10 }
  0x3a   :  { %v730_v17 = vand.u32 4294901760, %v729_v14  ;;  %v737_v18 = vand.u32 4294901760, %v736_v13 }
  0x3b   :  { %v1380_v19 = vpack.c.bf16 %v188_v16, %v181_v12 }
  0x3c   :  { %v1428_v21 = vpack.c.bf16 %v737_v18, %v730_v17 }
  0x3d   :  { %1381 = vmatprep.subr.bf16.mxu0 %v1380_v19 }
  0x3e   :  { %1429 = vmatprep.subr.bf16.mxu1 %v1428_v21  ;;  %1383 = vmatpush3.bf16.msra.mxu0 %v1380_v19 }
  0x3f   :  { %1431 = vmatpush3.bf16.msra.mxu1 %v1428_v21  ;;  %1385 = vmatprep.subr.bf16.mxu0 %v1384_v20 }
  0x40   :  { %1433 = vmatprep.subr.bf16.mxu1 %v1432_v25 }
  0x41   :  { %1256 = vmatmul.mubr.f32.vlgmr.msra.gmra.mrb[0].mxu0 %v1654_v31 }
  0x42   :  { %1322 = vmatmul.mubr.f32.vlgmr.msra.gmra.mrb[0].mxu1 %v1665_v36  ;;  %1387 = vmatpush3.bf16.msra.mxu0 %v1384_v20 }
  0x43   :  { %1435 = vmatpush3.bf16.msra.mxu1 %v1432_v25  ;;  %1389 = vmatprep.subr.bf16.mxu0 %v1388_v28 }
  0x44   :  { %1437 = vmatprep.subr.bf16.mxu1 %v1436_v33  ;;  %1266 = vmatprep.mubr.f32.mxu0 %v1652_v30 }
  0x45   :  { %1332 = vmatprep.mubr.f32.mxu1 %v1662_v34 }
  0x46   :  { %1391 = vmatpush3.bf16.msra.mxu0 %v1388_v28 }
  0x47   :  { %1439 = vmatpush3.bf16.msra.mxu1 %v1436_v33  ;;  %1393 = vmatprep.subr.bf16.mxu0 %v1618_v15 }
  0x48   :  { %1441 = vmatprep.subr.bf16.mxu1 %v1632_v22 }
  0x49   :  { %1267 = vmatmul.mubr.f32.vlgmr.msra.gmra.mrb[0].mxu0 %v1672_v39 }
  0x4a   :  { %1333 = vmatmul.mubr.f32.vlgmr.msra.gmra.mrb[0].mxu1 %v1682_v44  ;;  %1395 = vmatpush3.bf16.msra.mxu0 %v1618_v15 }
  0x4b   :  { %1443 = vmatpush3.bf16.msra.mxu1 %v1632_v22  ;;  %1397 = vmatprep.subr.bf16.mxu0 %v1636_v23 }
  0x4c   :  { %1445 = vmatprep.subr.bf16.mxu1 %v1642_v26  ;;  %1277 = vmatprep.mubr.f32.mxu0 %v144_v38 }
  0x4d   :  { %1343 = vmatprep.mubr.f32.mxu1 %v693_v42 }
  0x4e   :  { %1399 = vmatpush3.bf16.msra.mxu0 %v1636_v23 }
  0x4f   :  { %1447 = vmatpush3.bf16.msra.mxu1 %v1642_v26  ;;  %1401 = vmatprep.subr.bf16.mxu0 %v1400_v43 }
  0x50   :  { %1449 = vmatprep.subr.bf16.mxu1 %v1448_v46 }
  0x51   :  { %1278 = vmatmul.mubr.f32.vlgmr.msra.gmra.mrb[0].mxu0 %v154_v47 }
  0x52   :  { %1344 = vmatmul.mubr.f32.vlgmr.msra.gmra.mrb[0].mxu1 %v703_v52  ;;  %1403 = vmatpush3.bf16.msra.mxu0 %v1400_v43 }
  0x53   :  { %1451 = vmatpush3.bf16.msra.mxu1 %v1448_v46  ;;  %1405 = vmatprep.subr.bf16.mxu0 %v1404_v29 }
  0x54   :  { %1453 = vmatprep.subr.bf16.mxu1 %v1452_v32  ;;  %1288 = vmatprep.mubr.f32.mxu0 %v1638_v24 }
  0x55   :  { %1354 = vmatprep.mubr.f32.mxu1 %v1644_v27 }
  0x56   :  { %1407 = vmatpush3.bf16.msra.mxu0 %v1404_v29 }
  0x57   :  { %1455 = vmatpush3.bf16.msra.mxu1 %v1452_v32  ;;  %1409 = vmatprep.subr.bf16.mxu0 %v1618_v15 }
  0x58   :  { %1457 = vmatprep.subr.bf16.mxu1 %v1632_v22 }
  0x59   :  { %1289 = vmatmul.mubr.f32.vlgmr.msra.gmra.mrb[0].mxu0 %v1654_v31 }
  0x5a   :  { %1355 = vmatmul.mubr.f32.vlgmr.msra.gmra.mrb[0].mxu1 %v1665_v36  ;;  %1411 = vmatpush3.bf16.msra.mxu0 %v1618_v15  ;;  %v1162_v15 = vld [vmem:[%s1804_s4] ss:$0 sm:$0xff] }
  0x5b   :  { %1459 = vmatpush3.bf16.msra.mxu1 %v1632_v22  ;;  %1413 = vmatprep.subr.bf16.mxu0 %v1636_v23  ;;  %v1163_v22 = vld [vmem:[%s1805_s5] ss:$0 sm:$0xff] }
  0x5c   :  { %1461 = vmatprep.subr.bf16.mxu1 %v1642_v26  ;;  %1299 = vmatprep.mubr.f32.mxu0 %v1638_v24 }
  0x5d   :  { %1365 = vmatprep.mubr.f32.mxu1 %v1644_v27 }
  0x5e   :  { %1415 = vmatpush3.bf16.msra.mxu0 %v1636_v23 }
  0x5f   :  { %1463 = vmatpush3.bf16.msra.mxu1 %v1642_v26 }
  0x61   :  { %1300 = vmatmul.mubr.f32.vlgmr.msra.gmra.mrb[0].mxu0 %v1654_v31 }
  0x62   :  { %1366 = vmatmul.mubr.f32.vlgmr.msra.gmra.mrb[0].mxu1 %v1665_v36 }
 0x134   :  { %v1301_v30 = vpop.f32.mrb[0].mxu0 }
 0x135   :  { %v1464_v24 = vadd.f32 %v1301_v30, %v1162_v15  ;;  %v1367_v34 = vpop.f32.mrb[0].mxu1  ;;  %v591_v27 = vpop.f32.mrb[1].mxu0 }
 0x136   :  { %v1466_v35 = vadd.f32 %v1367_v34, %v1163_v22  ;;  %v1465_v23 = vadd.f32 %v1162_v15, %v591_v27  ;;  %v1140_v37 = vpop.f32.mrb[1].mxu1 }
 0x137   :  { %602 = vst.msk [vmem:[%s1806_s6 + $0x8] sm:$0xff] %vm66_vm0, %v1464_v24  ;;  %v1467_v26 = vadd.f32 %v1163_v22, %v1140_v37 }
 0x138   :  { %1151 = vst.msk [vmem:[%s1807_s7 + $0x8] sm:$0xff] %vm66_vm0, %v1466_v35  ;;  %601 = vst.msk [vmem:[%s1806_s6] sm:$0xff] %vm66_vm0, %v1465_v23 }
 0x139   :  { %1150 = vst.msk [vmem:[%s1807_s7] sm:$0xff] %vm66_vm0, %v1467_v26 }
 0x13a   :  { %1160 = vsyncpa [#allocation3], 1 }
 0x13b   :  { %1161 = vsyncpa [#allocation5], 1 }

</bundles_post_ra>
